<compile_context>
chip_gen: v6e
topology: v6e:2x2x1
jax: 0.10.0
libtpu: 0.0.40
codegen_flags: <defaults>
</compile_context>

<pallas_src>
import jax
import jax.numpy as jnp
from jax.experimental import pallas as pl
from jax.experimental.pallas import tpu as pltpu

LANE = 128
NEG_SLOPE = 0.01  # torch.nn.functional.leaky_relu default


def _round_up(x, m):
    return ((x + m - 1) // m) * m


def _leaky_relu(x, negative_slope=NEG_SLOPE):
    # identical to where(x>0, x, slope*x) for 0 < slope < 1, but mul+max only
    return jnp.maximum(x, negative_slope * x)


def qnetwork_kernel(x_ref, w1_ref, w2_ref, w3_ref, w4_ref, b_ref, out_ref):
    # x_ref: (TB, l1) f32      w*_ref: (in, out) bf16 (resident in VMEM)
    # b_ref: (4, 128) f32      out_ref: (TB, l5) f32
    b = b_ref[...]
    n1 = w1_ref.shape[1]
    n2 = w2_ref.shape[1]
    n3 = w3_ref.shape[1]
    n4 = w4_ref.shape[1]

    # Cast under the pipelined DMA: cost hides under the matmuls, and we avoid
    # a separate wrapper-side f32->bf16 HBM pass.
    x = x_ref[...].astype(jnp.bfloat16)

    h = jnp.dot(x, w1_ref[...], preferred_element_type=jnp.float32)
    # bias + activation in bf16 (cast needed for next MXU matmul anyway)
    h = _leaky_relu(h.astype(jnp.bfloat16) + b[0:1, :n1].astype(jnp.bfloat16))

    h = jnp.dot(h, w2_ref[...], preferred_element_type=jnp.float32)
    h = _leaky_relu(h.astype(jnp.bfloat16) + b[1:2, :n2].astype(jnp.bfloat16))

    h = jnp.dot(h, w3_ref[...], preferred_element_type=jnp.float32)
    h = _leaky_relu(h.astype(jnp.bfloat16) + b[2:3, :n3].astype(jnp.bfloat16))

    h = jnp.dot(h, w4_ref[...], preferred_element_type=jnp.float32)
    out_ref[...] = (h + b[3:4, :n4]).astype(out_ref.dtype)


def prepare_params(params):
    """One-time parameter prep (hoisted out of the forward path).

    params: list of 4 (W [in, out], b [1, out]) float32 layers.
    Returns (w1_bf16, w2_bf16, w3_bf16, w4_bf16, bias_all_f32[4,128]).
    """
    assert len(params) == 4
    ws = tuple(w.astype(jnp.bfloat16) for w, _ in params)
    bias_all = jnp.zeros((4, LANE), jnp.float32)
    for i, (_, b) in enumerate(params):
        width = b.shape[-1]
        assert width <= LANE
        bias_all = bias_all.at[i, :width].set(b.reshape(-1))
    return ws + (bias_all,)


def qnetwork_forward(x, prepped, *, batch_tile=4096):
    """x: [B, l1] float32; prepped: output of prepare_params()."""
    w1, w2, w3, w4, bias_all = prepped
    B, l1 = x.shape
    l2, l3, l4, l5 = w1.shape[1], w2.shape[1], w3.shape[1], w4.shape[1]
    assert w1.shape[0] == l1

    # Batch tile: big enough to amortize the ~0.35us per-grid-step overhead,
    # small enough for v7x's 64 MiB VMEM, and capped at ceil(B/2) rows so the
    # "parallel" axis has >= 2 tiles for the 2 v7x TensorCores when possible.
    # No explicit padding of x: grid = cdiv(B, TB) and Pallas masks the ragged
    # last block (OOB reads are only seen by masked-out output rows).
    half = _round_up(pl.cdiv(B, 2), 8)
    TB = max(8, min(batch_tile, half))
    grid = (pl.cdiv(B, TB),)

    def resident(shape):
        # Constant block index -> fetched once, stays resident across batch steps.
        return pl.BlockSpec(shape, lambda i: (0, 0))

    flops = 2 * B * (l1 * l2 + l2 * l3 + l3 * l4 + l4 * l5)
    bytes_accessed = (
        B * l1 * 4                                 # x read (f32)
        + B * l5 * 4                               # out write (f32)
        + sum(int(w.size) * 2 for w in (w1, w2, w3, w4))
        + int(bias_all.size) * 4
    )

    out = pl.pallas_call(
        qnetwork_kernel,
        out_shape=jax.ShapeDtypeStruct((B, l5), jnp.float32),
        grid=grid,
        in_specs=[
            pl.BlockSpec((TB, l1), lambda i: (i, 0)),  # streamed activations
            resident(w1.shape),
            resident(w2.shape),
            resident(w3.shape),
            resident(w4.shape),
            resident(bias_all.shape),
        ],
        out_specs=pl.BlockSpec((TB, l5), lambda i: (i, 0)),
        compiler_params=pltpu.CompilerParams(
            dimension_semantics=("parallel",)),
        cost_estimate=pl.CostEstimate(
            flops=flops, transcendentals=0, bytes_accessed=bytes_accessed),
    )(x, w1, w2, w3, w4, bias_all)

    return out


def init_params(key, layer_sizes):
    """PyTorch-Linear-style init (uniform +-1/sqrt(fan_in)); weights stored
    as [in, out] (transposed from PyTorch's [out, in])."""
    params = []
    for fan_in, fan_out in zip(layer_sizes[:-1], layer_sizes[1:]):
        key, kw, kb = jax.random.split(key, 3)
        bound = 1.0 / jnp.sqrt(jnp.float32(fan_in))
        w = jax.random.uniform(kw, (fan_in, fan_out), jnp.float32, -bound, bound)
        b = jax.random.uniform(kb, (1, fan_out), jnp.float32, -bound, bound)
        params.append((w, b))
    return params


def reference_forward(x, params):
    h = x
    for i, (w, b) in enumerate(params):
        h = jnp.dot(h, w) + b
        if i < len(params) - 1:
            h = _leaky_relu(h)
    return h


if __name__ == "__main__":
    key = jax.random.PRNGKey(0)
    # QNetwork(l1, l2, l3, l4, l5)
    l1, l2, l3, l4, l5 = 16, 64, 64, 32, 8

    k_in, k_in2, k_params = jax.random.split(key, 3)
    params = init_params(k_params, (l1, l2, l3, l4, l5))
    prepped = prepare_params(params)   # one-time prep, reused across calls

    # Small case (single grid step, exact tile).
    x_small = jax.random.normal(k_in, (8, l1), jnp.float32)
    out_small = jax.block_until_ready(qnetwork_forward(x_small, prepped))
    ref_small = reference_forward(x_small, params)
    assert out_small.shape == (8, l5)
    # bf16 matmul/activation path -> loosened tolerance vs f32 reference
    assert jnp.allclose(out_small, ref_small, atol=5e-2, rtol=5e-2)

    # Larger batch, default tiling: 2 grid steps (v7x megacore path) with a
    # ragged (masked) last block.
    x_big = jax.random.normal(k_in2, (300, l1), jnp.float32)
    out_big = jax.block_until_ready(qnetwork_forward(x_big, prepped))
    ref_big = reference_forward(x_big, params)
    assert out_big.shape == (300, l5)
    assert jnp.allclose(out_big, ref_big, atol=5e-2, rtol=5e-2)

    # Same batch with a small explicit tile: 3 grid steps + masked tail.
    out_big2 = jax.block_until_ready(
        qnetwork_forward(x_big, prepped, batch_tile=128))
    assert out_big2.shape == (300, l5)
    assert jnp.allclose(out_big2, ref_big, atol=5e-2, rtol=5e-2)

    print("KERNEL_OK")
</pallas_src>

<mosaic_0001>
module attributes {stable_mosaic.version = 11 : i64} {
  func.func @qnetwork_kernel(%arg0: i32, %arg1: memref<8x16xf32, #tpu.memory_space<vmem>>, %arg2: memref<16x64xbf16, #tpu.memory_space<vmem>>, %arg3: memref<64x64xbf16, #tpu.memory_space<vmem>>, %arg4: memref<64x32xbf16, #tpu.memory_space<vmem>>, %arg5: memref<32x8xbf16, #tpu.memory_space<vmem>>, %arg6: memref<4x128xf32, #tpu.memory_space<vmem>>, %arg7: memref<8x8xf32, #tpu.memory_space<vmem>>) attributes {dimension_semantics = [#tpu.dimension_semantics<parallel>], iteration_bounds = array<i64: 1>, scalar_prefetch = 0 : i64, scratch_operands = 0 : i64, tpu.core_type = #tpu.core_type<tc>, window_params = [{transform_indices = @transform_0, window_bounds = array<i64: 8, 16>}, {pipeline_mode = #tpu.pipeline_mode<synchronous>, transform_indices = @transform_1, window_bounds = array<i64: 16, 64>}, {pipeline_mode = #tpu.pipeline_mode<synchronous>, transform_indices = @transform_2, window_bounds = array<i64: 64, 64>}, {pipeline_mode = #tpu.pipeline_mode<synchronous>, transform_indices = @transform_3, window_bounds = array<i64: 64, 32>}, {pipeline_mode = #tpu.pipeline_mode<synchronous>, transform_indices = @transform_4, window_bounds = array<i64: 32, 8>}, {pipeline_mode = #tpu.pipeline_mode<synchronous>, transform_indices = @transform_5, window_bounds = array<i64: 4, 128>}, {transform_indices = @transform_6, window_bounds = array<i64: 8, 8>}]} {
    %c0 = arith.constant 0 : index
    %c0_0 = arith.constant 0 : index
    %0 = vector.load %arg6[%c0, %c0_0] : memref<4x128xf32, #tpu.memory_space<vmem>>, vector<4x128xf32>
    %c0_1 = arith.constant 0 : index
    %c0_2 = arith.constant 0 : index
    %1 = vector.load %arg1[%c0_1, %c0_2] : memref<8x16xf32, #tpu.memory_space<vmem>>, vector<8x16xf32>
    %2 = arith.truncf %1 : vector<8x16xf32> to vector<8x16xbf16>
    %c0_3 = arith.constant 0 : index
    %c0_4 = arith.constant 0 : index
    %3 = vector.load %arg2[%c0_3, %c0_4] : memref<16x64xbf16, #tpu.memory_space<vmem>>, vector<16x64xbf16>
    %cst = arith.constant dense<0.000000e+00> : vector<8x64xf32>
    %4 = tpu.matmul %2, %3, %cst {dimension_numbers = #tpu.dot_dimension_numbers<[1], [0], [0], [1], [0, 0, 1, 1], [], []>} : vector<8x16xbf16>, vector<16x64xbf16>, vector<8x64xf32> -> vector<8x64xf32>
    %5 = arith.truncf %4 : vector<8x64xf32> to vector<8x64xbf16>
    %6 = vector.extract_strided_slice %0 {offsets = [0, 0], sizes = [1, 64], strides = [1, 1]} : vector<4x128xf32> to vector<1x64xf32>
    %7 = arith.truncf %6 : vector<1x64xf32> to vector<1x64xbf16>
    %8 = vector.broadcast %7 : vector<1x64xbf16> to vector<8x64xbf16>
    %9 = arith.addf %5, %8 : vector<8x64xbf16>
    %cst_5 = arith.constant 1.000980e-02 : bf16
    %10 = vector.broadcast %cst_5 : bf16 to vector<8x64xbf16>
    %11 = arith.mulf %10, %9 : vector<8x64xbf16>
    %12 = arith.maximumf %9, %11 : vector<8x64xbf16>
    %c0_6 = arith.constant 0 : index
    %c0_7 = arith.constant 0 : index
    %13 = vector.load %arg3[%c0_6, %c0_7] : memref<64x64xbf16, #tpu.memory_space<vmem>>, vector<64x64xbf16>
    %cst_8 = arith.constant dense<0.000000e+00> : vector<8x64xf32>
    %14 = tpu.matmul %12, %13, %cst_8 {dimension_numbers = #tpu.dot_dimension_numbers<[1], [0], [0], [1], [0, 0, 1, 1], [], []>} : vector<8x64xbf16>, vector<64x64xbf16>, vector<8x64xf32> -> vector<8x64xf32>
    %15 = arith.truncf %14 : vector<8x64xf32> to vector<8x64xbf16>
    %16 = vector.extract_strided_slice %0 {offsets = [1, 0], sizes = [1, 64], strides = [1, 1]} : vector<4x128xf32> to vector<1x64xf32>
    %17 = arith.truncf %16 : vector<1x64xf32> to vector<1x64xbf16>
    %18 = vector.broadcast %17 : vector<1x64xbf16> to vector<8x64xbf16>
    %19 = arith.addf %15, %18 : vector<8x64xbf16>
    %cst_9 = arith.constant 1.000980e-02 : bf16
    %20 = vector.broadcast %cst_9 : bf16 to vector<8x64xbf16>
    %21 = arith.mulf %20, %19 : vector<8x64xbf16>
    %22 = arith.maximumf %19, %21 : vector<8x64xbf16>
    %c0_10 = arith.constant 0 : index
    %c0_11 = arith.constant 0 : index
    %23 = vector.load %arg4[%c0_10, %c0_11] : memref<64x32xbf16, #tpu.memory_space<vmem>>, vector<64x32xbf16>
    %cst_12 = arith.constant dense<0.000000e+00> : vector<8x32xf32>
    %24 = tpu.matmul %22, %23, %cst_12 {dimension_numbers = #tpu.dot_dimension_numbers<[1], [0], [0], [1], [0, 0, 1, 1], [], []>} : vector<8x64xbf16>, vector<64x32xbf16>, vector<8x32xf32> -> vector<8x32xf32>
    %25 = arith.truncf %24 : vector<8x32xf32> to vector<8x32xbf16>
    %26 = vector.extract_strided_slice %0 {offsets = [2, 0], sizes = [1, 32], strides = [1, 1]} : vector<4x128xf32> to vector<1x32xf32>
    %27 = arith.truncf %26 : vector<1x32xf32> to vector<1x32xbf16>
    %28 = vector.broadcast %27 : vector<1x32xbf16> to vector<8x32xbf16>
    %29 = arith.addf %25, %28 : vector<8x32xbf16>
    %cst_13 = arith.constant 1.000980e-02 : bf16
    %30 = vector.broadcast %cst_13 : bf16 to vector<8x32xbf16>
    %31 = arith.mulf %30, %29 : vector<8x32xbf16>
    %32 = arith.maximumf %29, %31 : vector<8x32xbf16>
    %c0_14 = arith.constant 0 : index
    %c0_15 = arith.constant 0 : index
    %33 = vector.load %arg5[%c0_14, %c0_15] : memref<32x8xbf16, #tpu.memory_space<vmem>>, vector<32x8xbf16>
    %cst_16 = arith.constant dense<0.000000e+00> : vector<8x8xf32>
    %34 = tpu.matmul %32, %33, %cst_16 {dimension_numbers = #tpu.dot_dimension_numbers<[1], [0], [0], [1], [0, 0, 1, 1], [], []>} : vector<8x32xbf16>, vector<32x8xbf16>, vector<8x8xf32> -> vector<8x8xf32>
    %35 = vector.extract_strided_slice %0 {offsets = [3, 0], sizes = [1, 8], strides = [1, 1]} : vector<4x128xf32> to vector<1x8xf32>
    %36 = vector.broadcast %35 : vector<1x8xf32> to vector<8x8xf32>
    %37 = arith.addf %34, %36 : vector<8x8xf32>
    %c0_17 = arith.constant 0 : index
    %c0_18 = arith.constant 0 : index
    %38 = vector.load %arg7[%c0_17, %c0_18] : memref<8x8xf32, #tpu.memory_space<vmem>>, vector<8x8xf32>
    tpu.vector_store %arg7[%c0_17, %c0_18], %37 {strides = array<i32>} : memref<8x8xf32, #tpu.memory_space<vmem>>, vector<8x8xf32>,
    return
  }
  func.func @transform_0(%arg0: i32) -> (i32, i32) {
    %c0_i32 = arith.constant 0 : i32
    %c0_i32_0 = arith.constant 0 : i32
    return %arg0, %c0_i32 : i32, i32
  }
  func.func @transform_1(%arg0: i32) -> (i32, i32) {
    %c0_i32 = arith.constant 0 : i32
    %c0_i32_0 = arith.constant 0 : i32
    %c0_i32_1 = arith.constant 0 : i32
    return %c0_i32, %c0_i32_0 : i32, i32
  }
  func.func @transform_2(%arg0: i32) -> (i32, i32) {
    %c0_i32 = arith.constant 0 : i32
    %c0_i32_0 = arith.constant 0 : i32
    %c0_i32_1 = arith.constant 0 : i32
    return %c0_i32, %c0_i32_0 : i32, i32
  }
  func.func @transform_3(%arg0: i32) -> (i32, i32) {
    %c0_i32 = arith.constant 0 : i32
    %c0_i32_0 = arith.constant 0 : i32
    %c0_i32_1 = arith.constant 0 : i32
    return %c0_i32, %c0_i32_0 : i32, i32
  }
  func.func @transform_4(%arg0: i32) -> (i32, i32) {
    %c0_i32 = arith.constant 0 : i32
    %c0_i32_0 = arith.constant 0 : i32
    %c0_i32_1 = arith.constant 0 : i32
    return %c0_i32, %c0_i32_0 : i32, i32
  }
  func.func @transform_5(%arg0: i32) -> (i32, i32) {
    %c0_i32 = arith.constant 0 : i32
    %c0_i32_0 = arith.constant 0 : i32
    %c0_i32_1 = arith.constant 0 : i32
    return %c0_i32, %c0_i32_0 : i32, i32
  }
  func.func @transform_6(%arg0: i32) -> (i32, i32) {
    %c0_i32 = arith.constant 0 : i32
    %c0_i32_0 = arith.constant 0 : i32
    return %arg0, %c0_i32 : i32, i32
  }
}

</mosaic_0001>

<bundles_post_ra>
// kernel: tpu_custom_call.1
= control target key start
LH: loop header
LB: loop body
LE: loop exit
PB: predicated region body
PF: predicated region fallthrough
CT: control target
= control target key end

     0   :  { %v447_v1 = vmov 0.0   ;;  %vm37_vm0 = vcmask 130048   ;;  %vm448_vm1 = vmmov 0   ;;  %s548_s0 = inlined_call_operand.vmem [shape: f32[8,16], index: 0, kind: input, shape index: {}]   ;;  %s549_s1 = inlined_call_operand.vmem [shape: bf16[16,64], index: 1, kind: input, shape index: {}]   ;;  %s550_s2 = inlined_call_operand.vmem [shape: bf16[64,64], index: 2, kind: input, shape index: {}]   ;;  %s551_s3 = inlined_call_operand.vmem [shape: bf16[64,32], index: 3, kind: input, shape index: {}]   ;;  %s552_s4 = inlined_call_operand.vmem [shape: bf16[32,8], index: 4, kind: input, shape index: {}]   ;;  %s553_s5 = inlined_call_operand.vmem [shape: f32[4,128], index: 5, kind: input, shape index: {}]   ;;  %s554_s6 = inlined_call_operand.hbm [shape: f32[8,8], index: 6, kind: output, shape index: {}]  }
   0x1   :  { %v414_v0 = vld [vmem:[%s549_s1] sm:$0xff]   ;;  %373 = vmatprep.subr.bf16.mxu0 %v447_v1  ;;  %379 = vmatprep.subr.bf16.mxu1 %v447_v1  ;;  %v415_v3 = vld [vmem:[%s550_s2 + $0x18] sm:$0xff]   ;;  %v416_v5 = vld [vmem:[%s550_s2 + $0x10] sm:$0xff]  }
   0x2   :  { %v27_v2 = vld [vmem:[%s548_s0] sm:$0xff]  ;;  %374 = vmatpush3.bf16.msra.mxu0 %v414_v0  ;;  %375 = vmatprep.mubr.msk.bf16.mxu0 %vm448_vm1, %v447_v1 }
   0x3   :  { %v28_v4 = vpack.c.bf16 %v27_v2, %v27_v2  ;;  %380 = vmatpush3.bf16.msra.mxu1 %v415_v3  ;;  %387 = vmatprep.mubr.msk.bf16.mxu1 %vm448_vm1, %v447_v1 }
   0x4   :  { %381 = vmatprep.subr.bf16.mxu1 %v447_v1  ;;  %391 = vmatprep.subr.bf16.mxu0 %v447_v1 }
   0x5   :  { %376 = vmatmul.mubr.msk.bf16.vlgmr.msra.gmra.mxu0 %vm37_vm0, %v28_v4 }
   0x6   :  { %399 = vmatprep.mubr.msk.bf16.mxu0 %vm448_vm1, %v447_v1 }
   0x7   :  { %382 = vmatpush3.bf16.msra.mxu1 %v416_v5 }
   0x8   :  { %383 = vmatprep.subr.bf16.mxu1 %v447_v1 }
   0x9   :  { %11 = vsyncpa [#allocation3], 0  ;;  %v417_v6 = vld [vmem:[%s550_s2 + $0x8] sm:$0xff]   ;;  %v418_v7 = vld [vmem:[%s550_s2] sm:$0xff]   ;;  %v86_v10 = vlaneseq  ;;  %vm125_vm2 = vcmask 523264   ;;  %vm283_vm3 = vcmask 261120  }
   0xa   :  { %v419_v8 = vld [vmem:[%s551_s3 + $0x18] sm:$0xff]   ;;  %v420_v9 = vld [vmem:[%s551_s3 + $0x10] sm:$0xff]   ;;  %v26_v11 = vld [vmem:[%s553_s5] sm:$0xf]  ;;  %s449_s18 = smov [#allocation2]   ;;  %vm327_vm4 = vcmask 64512  }
   0xb   :  { %384 = vmatpush3.bf16.msra.mxu1 %v417_v6  ;;  %392 = vmatpush3.bf16.msra.mxu0 %v419_v8  ;;  %v82_v12 = vpack.c.bf16 %v26_v11, %v26_v11  ;;  %v87_v13 = vshrl.u32 %v86_v10, 7  ;;  %v421_v25 = vld [vmem:[%s551_s3 + $0x8] sm:$0xff]   ;;  %v422_v26 = vld [vmem:[%s551_s3] sm:$0xff]   ;;  %s335_s19 = sshll.u32 %s449_s18, 4  ;;  %s336_s19 = int_to_ptr.vmem [resolvable:$true] %s335_s19 }
   0xc   :  { %385 = vmatprep.subr.bf16.mxu1 %v447_v1  ;;  %393 = vmatprep.subr.bf16.mxu0 %v447_v1  ;;  %v423_v38 = vld [vmem:[%s552_s4 + $0x8] sm:$0xff]   ;;  %v424_v39 = vld [vmem:[%s552_s4] sm:$0xff]   ;;  %s425_s4 = scalar_lea.vmem %s336_s19, 128  ;;  %p430_p1 = scmp.lt.s32.totalorder %s336_s19, %s336_s19 }
   0xd   :  { %v84_v14 = vpack.i.b16 %v82_v12, %v82_v12  ;;  %v88_v15 = vsub.s32 0, %v87_v13  ;;  %v170_v27 = vshrl.u32 %v82_v12, 16  ;;  %v258_v40 = vsub.s32 1, %v87_v13  ;;  %p426_p0 = scmp.ne.s32.totalorder %s336_s19, %s425_s4  ;;  %p431_p2 = scmp.lt.s32.totalorder %s425_s4, %s425_s4 }
   0xe   :  { %v269_v50 = vsub.s32 3, %v87_v13 }
   0xf   :  { %386 = vmatpush3.bf16.msra.mxu1 %v418_v7  ;;  %394 = vmatpush3.bf16.msra.mxu0 %v420_v9  ;;  %v89_v16 = vrot.slane %v84_v14, %v88_v15  ;;  %v171_v28 = vpack.i.b16 %v170_v27, %v170_v27  ;;  %v259_v41 = vrot.slane %v84_v14, %v258_v40  ;;  %p432_p3 = por %p431_p2, %p430_p1 }
  0x10   :  { %403 = vmatprep.subr.bf16.mxu1 %v447_v1  ;;  %395 = vmatprep.subr.bf16.mxu0 %v447_v1  ;;  %v270_v51 = vrot.slane %v26_v11, %v269_v50 }
  0x11   :  { %v176_v29 = vrot.slane %v171_v28, %v88_v15  ;;  %p433_p4 = pnand %p432_p3, %p426_p0 }
  0x13   :  { %396 = vmatpush3.bf16.msra.mxu0 %v421_v25 }
  0x14   :  { %397 = vmatprep.subr.bf16.mxu0 %v447_v1 }
  0x17   :  { %398 = vmatpush3.bf16.msra.mxu0 %v422_v26 }
  0xc5   :  { %v75_v17 = vpop.f32.mrf.mxu0 }
  0xc6   :  { %v81_v18 = vpack.c.bf16 %v75_v17, %v75_v17 }
  0xc7   :  { %v377_v19 = vpop.f32.mrf.mxu0 }
  0xc8   :  { %v90_v20 = vadd.bf16 %v89_v16, %v81_v18 }
  0xc9   :  { %v78_v21 = vpop.f32.mrf.mxu0 }
  0xca   :  { %v91_v22 = vmul.bf16 1009007652, %v90_v20 }
  0xcb   :  { %v378_v23 = vpop.f32.mrf.mxu0 }
  0xcc   :  { %v92_v24 = vmax.bf16 %v91_v22, %v90_v20 }
  0xce   :  { %388 = vmatmul.mubr.msk.bf16.vlgmr.msra.gmra.mxu1 %vm125_vm2, %v92_v24 }
  0xcf   :  { %407 = vmatprep.mubr.msk.bf16.mxu1 %vm448_vm1, %v447_v1  ;;  %404 = vmatpush3.bf16.msra.mxu1 %v423_v38 }
  0xd0   :  { %405 = vmatprep.subr.bf16.mxu1 %v447_v1 }
  0xd3   :  { %406 = vmatpush3.bf16.msra.mxu1 %v424_v39 }
 0x18e   :  { %v163_v30 = vpop.f32.mrf.mxu1 }
 0x18f   :  { %v169_v31 = vpack.c.bf16 %v163_v30, %v163_v30 }
 0x190   :  { %v389_v32 = vpop.f32.mrf.mxu1 }
 0x191   :  { %v177_v33 = vadd.bf16 %v176_v29, %v169_v31 }
 0x192   :  { %v166_v34 = vpop.f32.mrf.mxu1 }
 0x193   :  { %v178_v35 = vmul.bf16 1009007652, %v177_v33 }
 0x194   :  { %v390_v36 = vpop.f32.mrf.mxu1 }
 0x195   :  { %v179_v37 = vmax.bf16 %v178_v35, %v177_v33 }
 0x197   :  { %400 = vmatmul.mubr.msk.bf16.vlgmr.msra.gmra.mxu0 %vm125_vm2, %v179_v37 }
 0x257   :  { %v249_v42 = vpop.f32.mrf.mxu0 }
 0x258   :  { %v255_v43 = vpack.c.bf16 %v249_v42, %v249_v42 }
 0x259   :  { %v401_v44 = vpop.f32.mrf.mxu0 }
 0x25a   :  { %v260_v45 = vadd.bf16 %v259_v41, %v255_v43 }
 0x25b   :  { %v252_v46 = vpop.f32.mrf.mxu0 }
 0x25c   :  { %v261_v47 = vmul.bf16 1009007652, %v260_v45 }
 0x25d   :  { %v402_v48 = vpop.f32.mrf.mxu0 }
 0x25e   :  { %v262_v49 = vmax.bf16 %v261_v47, %v260_v45 }
 0x260   :  { %408 = vmatmul.mubr.msk.bf16.vlgmr.msra.gmra.mxu1 %vm283_vm3, %v262_v49 }
 0x320   :  { %v321_v52 = vpop.f32.mrf.mxu1 }
 0x321   :  { %v322_v53 = vadd.f32 %v321_v52, %v270_v51 }
 0x322   :  { %v409_v54 = vpop.f32.mrf.mxu1 }
 0x323   :  { %328 = vst.msk [vmem:[#allocation2] sm:$0xff] %vm327_vm4, %v322_v53 }
 0x324   :  { %v324_v55 = vpop.f32.mrf.mxu1 }
 0x325   :  { %436 = shalt.err (!%p433_p4)
}
 0x326   :  { %338 = dma.vmem_to_hbm [thread:$0]  %s336_s19, 128, %s554_s6, [#allocation3]   ;;  %v410_v56 = vpop.f32.mrf.mxu1 }
 0x327   :  { %445 = dma.done.wait [#allocation3], 128  }
 0x328   :  { %446 = vsyncadd [#allocation3], 4294967168 }
 0x329   :  { %342 = vsyncpa [#allocation3], 1 }

</bundles_post_ra>
